<compile_context>
chip_gen: v5e
topology: v5e:2x2
jax: 0.10.0
libtpu: 0.0.40
codegen_flags: <defaults>
</compile_context>

<pallas_src>
import math
import functools

import jax
import jax.numpy as jnp
from jax import lax
from jax.experimental import pallas as pl
from jax.experimental.pallas import tpu as pltpu


def _round_up(x, m):
    return (x + m - 1) // m * m


def _pad_to(a, shape):
    pads = [(0, t - s) for s, t in zip(a.shape, shape)]
    if any(p for _, p in pads):
        a = jnp.pad(a, pads)
    return a


def _fit_tile(target, dim, align):
    """Largest multiple of `align` <= target (clamped to the aligned dim) that
    evenly divides the aligned dim.  Keeps per-call padding at most `align`-1
    elements, so big operands are never re-padded to tile multiples in HBM."""
    dim_a = _round_up(dim, align)
    t = max(align, min(_round_up(target, align), dim_a))
    while dim_a % t:
        t -= align
    return t, dim_a


_NT = (((1,), (1,)), ((), ()))  # contract last dims of both operands (x @ W.T)


def _lora_kernel(x_ref, w_ref, bias_ref, xa_ref, bl_ref, o_ref, acc_ref):
    k = pl.program_id(2)

    @pl.when(k == 0)
    def _():
        acc_ref[...] = jnp.zeros_like(acc_ref)

    # Base path: x[tm,tk] @ W[tn,tk].T -> [tm,tn], f32 accumulation (MXU).
    acc_ref[...] += lax.dot_general(
        x_ref[...], w_ref[...], _NT, preferred_element_type=jnp.float32)

    @pl.when(k == pl.num_programs(2) - 1)
    def _():
        # Once-per-(M,N)-tile epilogue: rank-r up-projection (bf16 x bf16 ->
        # f32 fast path; scale already folded into xa), bias add, cast.
        lora = lax.dot_general(
            xa_ref[...], bl_ref[...], _NT, preferred_element_type=jnp.float32)
        o_ref[...] = (acc_ref[...] + bias_ref[...].astype(jnp.float32)
                      + lora).astype(o_ref.dtype)


@functools.partial(jax.jit, static_argnames=("tm", "tn", "tk"))
def lora_linear(x, weight, bias, lora_A, lora_B, scale, *,
                tm=512, tn=1024, tk=1024):
    """LoRA linear forward.

    x: [M, K]; weight: [N, K]; bias: [N]; lora_A: [r, K]; lora_B: [N, r].
    Weights are used in their native PyTorch [out, in] layout (no host
    transposes).  Default tiles use ~10 MiB VMEM (fits every generation's
    scoped default); on v5e you may prefer tn=512 for the 4x128^2 MXU.
    """
    M, K = x.shape
    N, _ = weight.shape
    r = lora_A.shape[0]
    out_dtype = x.dtype

    # LoRA down-projection hoisted out of the kernel: tiny mem-bound matmul,
    # scale folded in, fed to the kernel as a narrow [M, r] operand.
    xa = (lax.dot_general(x, lora_A, _NT, preferred_element_type=jnp.float32)
          * scale).astype(x.dtype)

    # Tiles clamp to the problem and divide the 8/128-aligned dims.
    tm, Mp = _fit_tile(tm, M, 8)     # skinny-M collapses the M grid to 1 block
    tn, Np = _fit_tile(tn, N, 128)   # lane-dense output stores
    tk, Kp = _fit_tile(tk, K, 128)

    xp = _pad_to(x, (Mp, Kp))
    wp = _pad_to(weight, (Np, Kp))
    bp = _pad_to(bias.reshape(1, N), (1, Np))
    xap = _pad_to(xa, (Mp, r))
    blp = _pad_to(lora_B, (Np, r))

    grid = (Mp // tm, Np // tn, Kp // tk)

    itemsize = jnp.dtype(out_dtype).itemsize
    flops = 2 * Mp * Np * Kp + 2 * Mp * Np * r
    bytes_accessed = int(
        xp.size * xp.dtype.itemsize + wp.size * wp.dtype.itemsize
        + bp.size * bp.dtype.itemsize + xap.size * xap.dtype.itemsize
        + blp.size * blp.dtype.itemsize + Mp * Np * itemsize)

    out = pl.pallas_call(
        _lora_kernel,
        out_shape=jax.ShapeDtypeStruct((Mp, Np), out_dtype),
        grid_spec=pltpu.PrefetchScalarGridSpec(
            num_scalar_prefetch=0,
            grid=grid,
            in_specs=[
                pl.BlockSpec((tm, tk), lambda i, j, k: (i, k)),   # x      [M, K]
                pl.BlockSpec((tn, tk), lambda i, j, k: (j, k)),   # weight [N, K]
                pl.BlockSpec((1, tn), lambda i, j, k: (0, j)),    # bias   [1, N]
                pl.BlockSpec((tm, r), lambda i, j, k: (i, 0)),    # x@A.T*s [M, r]
                pl.BlockSpec((tn, r), lambda i, j, k: (j, 0)),    # lora_B [N, r]
            ],
            out_specs=pl.BlockSpec((tm, tn), lambda i, j, k: (i, j)),
            scratch_shapes=[
                pltpu.VMEM((tm, tn), jnp.float32),   # base f32 accumulator
            ],
        ),
        compiler_params=pltpu.CompilerParams(
            dimension_semantics=("parallel", "parallel", "arbitrary"),
        ),
        cost_estimate=pl.CostEstimate(
            flops=flops, transcendentals=0, bytes_accessed=bytes_accessed),
    )(xp, wp, bp, xap, blp)

    if (Mp, Np) != (M, N):
        out = out[:M, :N]
    return out


if __name__ == "__main__":
    # Small, forward-implied shapes: batch=2, seq=8 -> M=16 rows,
    # in_features=32, out_features=32, rank=8, alpha=32.
    batch, seq = 2, 8
    in_features, out_features = 32, 32
    rank, alpha = 8, 32
    scale = alpha / rank

    key = jax.random.PRNGKey(0)
    kx, kw, kb, ka, kbB = jax.random.split(key, 5)

    M = batch * seq
    x = jax.random.normal(kx, (M, in_features), dtype=jnp.float32)

    # nn.Linear default init: U(-1/sqrt(fan_in), 1/sqrt(fan_in))
    lin_bound = 1.0 / math.sqrt(in_features)
    weight = jax.random.uniform(kw, (out_features, in_features),
                                minval=-lin_bound, maxval=lin_bound,
                                dtype=jnp.float32)
    bias = jax.random.uniform(kb, (out_features,),
                              minval=-lin_bound, maxval=lin_bound,
                              dtype=jnp.float32)

    # kaiming_uniform_(a=sqrt(5)) on lora_A -> U(-1/sqrt(fan_in), 1/sqrt(fan_in))
    a_bound = 1.0 / math.sqrt(in_features)
    lora_A = jax.random.uniform(ka, (rank, in_features),
                                minval=-a_bound, maxval=a_bound,
                                dtype=jnp.float32)
    # Module inits lora_B to zeros; use small random values here so the LoRA
    # matmul path is actually exercised (deterministic, synthetic weights).
    lora_B = 0.01 * jax.random.normal(kbB, (out_features, rank),
                                      dtype=jnp.float32)

    # bf16 activations/weights, f32 accumulation inside the kernel.
    dt = jnp.bfloat16
    xb, wb, bb = x.astype(dt), weight.astype(dt), bias.astype(dt)
    ab, Bb = lora_A.astype(dt), lora_B.astype(dt)

    out = lora_linear(xb, wb, bb, ab, Bb, scale)
    out = jax.block_until_ready(out)

    # Reference (f32 math on the same bf16-quantized values), PyTorch forward:
    #   linear(x) + (x @ A.T @ B.T) * scale
    xf, wf, bf = xb.astype(jnp.float32), wb.astype(jnp.float32), bb.astype(jnp.float32)
    af, Bf = ab.astype(jnp.float32), Bb.astype(jnp.float32)
    ref = xf @ wf.T + bf + (xf @ af.T @ Bf.T) * scale

    assert out.shape == (M, out_features)
    err = jnp.max(jnp.abs(out.astype(jnp.float32) - ref))
    assert jnp.allclose(out.astype(jnp.float32), ref, atol=2e-2, rtol=2e-2), float(err)

    print("KERNEL_OK")
</pallas_src>

<mosaic_0001>
module attributes {stable_mosaic.version = 11 : i64} {
  func.func @_lora_kernel(%arg0: i32, %arg1: i32, %arg2: i32, %arg3: memref<16x128xbf16, #tpu.memory_space<vmem>>, %arg4: memref<128x128xbf16, #tpu.memory_space<vmem>>, %arg5: memref<1x128xbf16, #tpu.memory_space<vmem>>, %arg6: memref<16x8xbf16, #tpu.memory_space<vmem>>, %arg7: memref<128x8xbf16, #tpu.memory_space<vmem>>, %arg8: memref<16x128xbf16, #tpu.memory_space<vmem>>, %arg9: memref<16x128xf32, #tpu.memory_space<vmem>>) attributes {dimension_semantics = [#tpu.dimension_semantics<parallel>, #tpu.dimension_semantics<parallel>, #tpu.dimension_semantics<arbitrary>], iteration_bounds = array<i64: 1, 1, 1>, scalar_prefetch = 0 : i64, scratch_operands = 1 : i64, tpu.core_type = #tpu.core_type<tc>, window_params = [{transform_indices = @transform_0, window_bounds = array<i64: 16, 128>}, {transform_indices = @transform_1, window_bounds = array<i64: 128, 128>}, {transform_indices = @transform_2, window_bounds = array<i64: 1, 128>}, {transform_indices = @transform_3, window_bounds = array<i64: 16, 8>}, {transform_indices = @transform_4, window_bounds = array<i64: 128, 8>}, {transform_indices = @transform_5, window_bounds = array<i64: 16, 128>}]} {
    %c0_i32 = arith.constant 0 : i32
    %0 = arith.cmpi eq, %arg2, %c0_i32 : i32
    %1 = arith.extui %0 : i1 to i32
    %c0_i32_0 = arith.constant 0 : i32
    %2 = arith.cmpi ne, %1, %c0_i32_0 : i32
    scf.if %2 {
      %cst_10 = arith.constant 0.000000e+00 : f32
      %12 = vector.broadcast %cst_10 : f32 to vector<16x128xf32>
      %c0_11 = arith.constant 0 : index
      %c0_12 = arith.constant 0 : index
      %13 = vector.load %arg9[%c0_11, %c0_12] : memref<16x128xf32, #tpu.memory_space<vmem>>, vector<16x128xf32>
      tpu.vector_store %arg9[%c0_11, %c0_12], %12 {strides = array<i32>} : memref<16x128xf32, #tpu.memory_space<vmem>>, vector<16x128xf32>,
    } else {
    }
    %c0 = arith.constant 0 : index
    %c0_1 = arith.constant 0 : index
    %3 = vector.load %arg9[%c0, %c0_1] : memref<16x128xf32, #tpu.memory_space<vmem>>, vector<16x128xf32>
    %c0_2 = arith.constant 0 : index
    %c0_3 = arith.constant 0 : index
    %4 = vector.load %arg3[%c0_2, %c0_3] : memref<16x128xbf16, #tpu.memory_space<vmem>>, vector<16x128xbf16>
    %c0_4 = arith.constant 0 : index
    %c0_5 = arith.constant 0 : index
    %5 = vector.load %arg4[%c0_4, %c0_5] : memref<128x128xbf16, #tpu.memory_space<vmem>>, vector<128x128xbf16>
    %cst = arith.constant dense<0.000000e+00> : vector<16x128xf32>
    %6 = tpu.matmul %4, %5, %cst {dimension_numbers = #tpu.dot_dimension_numbers<[1], [1], [0], [0], [0, 0, 1, 0], [], []>} : vector<16x128xbf16>, vector<128x128xbf16>, vector<16x128xf32> -> vector<16x128xf32>
    %7 = arith.addf %3, %6 : vector<16x128xf32>
    %c0_6 = arith.constant 0 : index
    %c0_7 = arith.constant 0 : index
    %8 = vector.load %arg9[%c0_6, %c0_7] : memref<16x128xf32, #tpu.memory_space<vmem>>, vector<16x128xf32>
    tpu.vector_store %arg9[%c0_6, %c0_7], %7 {strides = array<i32>} : memref<16x128xf32, #tpu.memory_space<vmem>>, vector<16x128xf32>,
    %c0_i32_8 = arith.constant 0 : i32
    %9 = arith.cmpi eq, %arg2, %c0_i32_8 : i32
    %10 = arith.extui %9 : i1 to i32
    %c0_i32_9 = arith.constant 0 : i32
    %11 = arith.cmpi ne, %10, %c0_i32_9 : i32
    scf.if %11 {
      %c0_10 = arith.constant 0 : index
      %c0_11 = arith.constant 0 : index
      %12 = vector.load %arg6[%c0_10, %c0_11] : memref<16x8xbf16, #tpu.memory_space<vmem>>, vector<16x8xbf16>
      %c0_12 = arith.constant 0 : index
      %c0_13 = arith.constant 0 : index
      %13 = vector.load %arg7[%c0_12, %c0_13] : memref<128x8xbf16, #tpu.memory_space<vmem>>, vector<128x8xbf16>
      %cst_14 = arith.constant dense<0.000000e+00> : vector<16x128xf32>
      %14 = tpu.matmul %12, %13, %cst_14 {dimension_numbers = #tpu.dot_dimension_numbers<[1], [1], [0], [0], [0, 0, 1, 0], [], []>} : vector<16x8xbf16>, vector<128x8xbf16>, vector<16x128xf32> -> vector<16x128xf32>
      %c0_15 = arith.constant 0 : index
      %c0_16 = arith.constant 0 : index
      %15 = vector.load %arg9[%c0_15, %c0_16] : memref<16x128xf32, #tpu.memory_space<vmem>>, vector<16x128xf32>
      %c0_17 = arith.constant 0 : index
      %c0_18 = arith.constant 0 : index
      %16 = vector.load %arg5[%c0_17, %c0_18] : memref<1x128xbf16, #tpu.memory_space<vmem>>, vector<1x128xbf16>
      %17 = arith.extf %16 : vector<1x128xbf16> to vector<1x128xf32>
      %18 = vector.broadcast %17 : vector<1x128xf32> to vector<16x128xf32>
      %19 = arith.addf %15, %18 : vector<16x128xf32>
      %20 = arith.addf %19, %14 : vector<16x128xf32>
      %21 = arith.truncf %20 : vector<16x128xf32> to vector<16x128xbf16>
      %c0_19 = arith.constant 0 : index
      %c0_20 = arith.constant 0 : index
      %22 = vector.load %arg8[%c0_19, %c0_20] : memref<16x128xbf16, #tpu.memory_space<vmem>>, vector<16x128xbf16>
      tpu.vector_store %arg8[%c0_19, %c0_20], %21 {strides = array<i32>} : memref<16x128xbf16, #tpu.memory_space<vmem>>, vector<16x128xbf16>,
    } else {
    }
    return
  }
  func.func @transform_0(%arg0: i32, %arg1: i32, %arg2: i32) -> (i32, i32) {
    %c0_i32 = arith.constant 0 : i32
    return %arg0, %arg2 : i32, i32
  }
  func.func @transform_1(%arg0: i32, %arg1: i32, %arg2: i32) -> (i32, i32) {
    %c0_i32 = arith.constant 0 : i32
    return %arg1, %arg2 : i32, i32
  }
  func.func @transform_2(%arg0: i32, %arg1: i32, %arg2: i32) -> (i32, i32) {
    %c0_i32 = arith.constant 0 : i32
    %c0_i32_0 = arith.constant 0 : i32
    return %c0_i32, %arg1 : i32, i32
  }
  func.func @transform_3(%arg0: i32, %arg1: i32, %arg2: i32) -> (i32, i32) {
    %c0_i32 = arith.constant 0 : i32
    %c0_i32_0 = arith.constant 0 : i32
    return %arg0, %c0_i32 : i32, i32
  }
  func.func @transform_4(%arg0: i32, %arg1: i32, %arg2: i32) -> (i32, i32) {
    %c0_i32 = arith.constant 0 : i32
    %c0_i32_0 = arith.constant 0 : i32
    return %arg1, %c0_i32 : i32, i32
  }
  func.func @transform_5(%arg0: i32, %arg1: i32, %arg2: i32) -> (i32, i32) {
    %c0_i32 = arith.constant 0 : i32
    return %arg0, %arg1 : i32, i32
  }
}

</mosaic_0001>

<bundles_post_ra>
// kernel: lora_linear.1
= control target key start
LH: loop header
LB: loop body
LE: loop exit
PB: predicated region body
PF: predicated region fallthrough
CT: control target
= control target key end

     0   :  { %vm185_vm0 = vcmask 64512   ;;  %s485_s0 = inlined_call_operand.vmem [shape: bf16[16,128], index: 0, kind: input, shape index: {}]   ;;  %s486_s1 = inlined_call_operand.vmem [shape: bf16[128,128], index: 1, kind: input, shape index: {}]   ;;  %s487_s2 = inlined_call_operand.vmem [shape: bf16[1,128], index: 2, kind: input, shape index: {}]   ;;  %s488_s3 = inlined_call_operand.vmem [shape: bf16[16,8], index: 3, kind: input, shape index: {}]   ;;  %s489_s4 = inlined_call_operand.vmem [shape: bf16[128,8], index: 4, kind: input, shape index: {}]   ;;  %s490_s5 = inlined_call_operand.hbm [shape: bf16[16,128], index: 5, kind: output, shape index: {}]  }
   0x1   :  { %v339_v0 = vld [vmem:[%s486_s1 + $0x38] sm:$0xff] }
   0x2   :  { %v348_v1 = vld [vmem:[%s489_s4 + $0x38] sm:$0xff]  ;;  %101 = vmatpush.bf16.xpose.msra.mxu0 %v339_v0 }
   0x3   :  { %v211_v2 = vsel %vm185_vm0, %v348_v1, 0 }
   0x4   :  { %213 = vmatpush.bf16.xpose.msra.mxu1 %v211_v2 }
   0x5   :  { %10 = vsyncpa [#allocation4], 0  ;;  %v347_v3 = vld [vmem:[%s489_s4 + $0x30] sm:$0xff]  ;;  %v346_v6 = vld [vmem:[%s489_s4 + $0x28] sm:$0xff]  ;;  %s385_s7 = smov 4  }
   0x6   :  { %v338_v4 = vld [vmem:[%s486_s1 + $0x30] sm:$0xff]  ;;  %v208_v5 = vsel %vm185_vm0, %v347_v3, 0  ;;  %v337_v7 = vld [vmem:[%s486_s1 + $0x28] sm:$0xff]  ;;  %v205_v8 = vsel %vm185_vm0, %v346_v6, 0  ;;  %v345_v9 = vld [vmem:[%s489_s4 + $0x20] sm:$0xff] }
   0x7   :  { %v336_v10 = vld [vmem:[%s486_s1 + $0x20] sm:$0xff]  ;;  %v202_v11 = vsel %vm185_vm0, %v345_v9, 0  ;;  %v344_v12 = vld [vmem:[%s489_s4 + $0x18] sm:$0xff]  ;;  %v343_v15 = vld [vmem:[%s489_s4 + $0x10] sm:$0xff] }
   0x8   :  { %v335_v13 = vld [vmem:[%s486_s1 + $0x18] sm:$0xff]  ;;  %v199_v14 = vsel %vm185_vm0, %v344_v12, 0  ;;  %v334_v16 = vld [vmem:[%s486_s1 + $0x10] sm:$0xff]  ;;  %v196_v17 = vsel %vm185_vm0, %v343_v15, 0  ;;  %v342_v18 = vld [vmem:[%s489_s4 + $0x8] sm:$0xff] }
   0x9   :  { %v333_v19 = vld [vmem:[%s486_s1 + $0x8] sm:$0xff]  ;;  %v193_v20 = vsel %vm185_vm0, %v342_v18, 0  ;;  %v341_v21 = vld [vmem:[%s489_s4] sm:$0xff] }
   0xa   :  { %102 = vmatpush.bf16.xpose.msra.mxu0 %v338_v4  ;;  %v332_v22 = vld [vmem:[%s486_s1] sm:$0xff]  ;;  %v190_v23 = vsel %vm185_vm0, %v341_v21, 0 }
   0xb   :  { %v331_v24 = vld [vmem:[%s485_s0] sm:$0xff]  ;;  %s383_s0 = smov [#allocation3]  }
   0xc   :  { %214 = vmatpush.bf16.xpose.msra.mxu1 %v208_v5  ;;  %v340_v25 = vld [vmem:[%s488_s3] sm:$0xff]  ;;  %s244_s1 = sshll.u32 %s383_s0, 4  ;;  %s246_s3 = sshll.u32 %s490_s5, 4  ;;  %s245_s1 = int_to_ptr.vmem [resolvable:$true] %s244_s1  ;;  %s247_s3 = int_to_ptr.hbm [resolvable:$true] %s246_s3 }
   0xd   :  { %v229_v26 = vld [vmem:[%s487_s2] sm:$0x1]  ;;  %s384_s2 = smov 64  }
   0xe   :  { %v230_v27 = vunpack.c.l.bf16 %v229_v26 }
  0x10   :  { %v231_v30 = vperm.slane %v230_v27, 0 }
  0x12   :  { %103 = vmatpush.bf16.xpose.msra.mxu0 %v337_v7 }
  0x14   :  { %215 = vmatpush.bf16.xpose.msra.mxu1 %v205_v8 }
  0x1a   :  { %104 = vmatpush.bf16.xpose.msra.mxu0 %v336_v10 }
  0x1c   :  { %216 = vmatpush.bf16.xpose.msra.mxu1 %v202_v11 }
  0x22   :  { %105 = vmatpush.bf16.xpose.msra.mxu0 %v335_v13 }
  0x24   :  { %217 = vmatpush.bf16.xpose.msra.mxu1 %v199_v14 }
  0x2a   :  { %106 = vmatpush.bf16.xpose.msra.mxu0 %v334_v16 }
  0x2c   :  { %218 = vmatpush.bf16.xpose.msra.mxu1 %v196_v17 }
  0x32   :  { %107 = vmatpush.bf16.xpose.msra.mxu0 %v333_v19 }
  0x34   :  { %219 = vmatpush.bf16.xpose.msra.mxu1 %v193_v20 }
  0x3a   :  { %108 = vmatpush.bf16.xpose.msra.mxu0 %v332_v22 }
  0x3c   :  { %220 = vmatpush.bf16.xpose.msra.mxu1 %v190_v23 }
  0x41   :  { %109 = vmatmul.bf16.vlgmr.msra.gmra.mxu0 %v331_v24 }
  0x43   :  { %330 = vmatmul.msk.bf16.vlgmr.msra.gmra.mxu1 %vm185_vm0, %v340_v25 }
  0xbe   :  { %v110_v28 = vpop.f32.mrf.mxu0 }
  0xbf   :  { %v232_v31 = vadd.f32 %v231_v30, %v110_v28 }
  0xc0   :  { %v222_v29 = vpop.f32.mrf.mxu1 }
  0xc1   :  { %v234_v35 = vadd.f32 %v232_v31, %v222_v29 }
  0xc6   :  { %v112_v32 = vpop.f32.mrf.mxu0 }
  0xc7   :  { %v233_v33 = vadd.f32 %v231_v30, %v112_v32 }
  0xc8   :  { %v224_v34 = vpop.f32.mrf.mxu1 }
  0xc9   :  { %v235_v36 = vadd.f32 %v233_v33, %v224_v34 }
  0xcb   :  { %v352_v37 = vpack.c.bf16 %v235_v36, %v234_v35 }
  0xcd   :  { %353 = vst [vmem:[#allocation3] sm:$0xff] %v352_v37  }
  0xce   :  { %252 = dma.vmem_to_hbm [thread:$0]  %s245_s1, 128, %s247_s3, [#allocation4], %s384_s2, %s384_s2, %s385_s7  }
  0xcf   :  { %381 = dma.done.wait [#allocation4], 128  }
  0xd0   :  { %382 = vsyncadd [#allocation4], 4294967168 }
  0xd1   :  { %257 = vsyncpa [#allocation4], 1 }

</bundles_post_ra>
